<compile_context>
chip_gen: v6e
topology: v6e:2x2x1
jax: 0.10.0
libtpu: 0.0.40
codegen_flags: <defaults>
</compile_context>

<pallas_src>
import jax
import jax.numpy as jnp
import numpy as np
from jax.experimental import pallas as pl
from jax.experimental.pallas import tpu as pltpu

# Small, deterministic problem sizes consistent with the module's forward.
B, CIN, H, W = 2, 4, 16, 16
COUT, KH, KW = 8, 3, 3
HOUT, WOUT = H - KH + 1, W - KW + 1          # 14, 14 (VALID conv)
HW = HOUT * WOUT                             # 196 spatial outputs per image
F = COUT * HW                                # flattened feature size = 1568
KK = KH * KW * CIN                           # 36 im2col taps
KK1 = KK + 1                                 # +1 ones row carrying the bias
R = B * HW                                   # 392 total conv output positions


def trim_ft_kernel(patches_ref, w_ref, fcw_ref, pidx_ref, sel_ref, out_ref):
    # patches_ref: (KK1, R)  = (37, 392)  im2col columns (last row = 1.0 for bias)
    # w_ref:       (COUT, KK1) = (8, 37)  conv weight rows + bias column
    # fcw_ref:     (COUT, R) = (8, 392)   fc.weight in native (c, hw) order, tiled over B
    # pidx_ref:    (COUT, R) = (8, 392)   param_idx, same layout
    # sel_ref:     (R, B)    = (392, 2)   0/1 batch selector (column b owns batch b's rows)
    # out_ref:     (1, B)                 lane-dense output slab (transposed to (B,1) outside)

    # Conv + bias as one MXU dot: (8,37) @ (37,392) -> (8,392), f32 accumulate.
    conv = jnp.dot(w_ref[...], patches_ref[...],
                   preferred_element_type=jnp.float32)

    # mask = fc.weight * param_idx (in-kernel, native CHW flatten order).
    mask = fcw_ref[...] * pidx_ref[...]                      # (8, 392) VPU, lane-dense
    prod = conv * mask                                       # (8, 392) VPU, lane-dense

    # Per-batch masked reduction: MXU matvec against the 0/1 selector,
    # then a single sublane reduce over the COUT axis.
    per_cb = jnp.dot(prod, sel_ref[...],
                     preferred_element_type=jnp.float32)     # (8, B)
    out_ref[...] = jnp.sum(per_cb, axis=0, keepdims=True).astype(out_ref.dtype)


def trim_ft_forward(x_nchw, conv_w_oihw, conv_b, fc_w, param_idx):
    """Wrapper: layout plumbing only (im2col gather, transposes, constant
    selector).  All arithmetic (conv MAC + bias, mask multiply, masked
    reduction) happens inside the Pallas kernel."""
    f32 = jnp.float32
    x_nhwc = jnp.transpose(x_nchw, (0, 2, 3, 1)).astype(f32)           # (B, H, W, CIN)

    # im2col (zero-FLOP gather): rows ordered (b, h, w), cols ordered (kh, kw, ci).
    cols = [x_nhwc[:, kh:kh + HOUT, kw:kw + WOUT, :]
            for kh in range(KH) for kw in range(KW)]                   # 9 x (B,14,14,CIN)
    patches = jnp.concatenate(cols, axis=-1).reshape(R, KK)            # (392, 36)
    patches = jnp.concatenate([patches, jnp.ones((R, 1), f32)], axis=1)  # (392, 37)
    patches_t = patches.T                                              # (37, 392) lane-dense

    # Conv weight: (Cout, Cin, KH, KW) -> (Cout, KH, KW, Cin) -> (Cout, 36), + bias column.
    w_flat = jnp.transpose(conv_w_oihw, (0, 2, 3, 1)).reshape(COUT, KK).astype(f32)
    w_aug = jnp.concatenate([w_flat, conv_b.reshape(COUT, 1).astype(f32)], axis=1)  # (8, 37)

    # fc weight & param_idx in PyTorch's native (Cout, Hout*Wout) flatten order,
    # tiled along lanes over the batch (pure layout duplication).
    fcw_native = fc_w.reshape(COUT, HW).astype(f32)                    # (8, 196)
    pidx_native = param_idx.reshape(COUT, HW).astype(f32)              # (8, 196)
    fcw_t = jnp.tile(fcw_native, (1, B))                               # (8, 392)
    pidx_t = jnp.tile(pidx_native, (1, B))                             # (8, 392)

    # 0/1 batch selector: sel[r, b] = 1 iff row r belongs to batch b.
    sel = jnp.repeat(jnp.eye(B, dtype=f32), HW, axis=0)                # (392, 2)

    out_1b = pl.pallas_call(
        trim_ft_kernel,
        out_shape=jax.ShapeDtypeStruct((1, B), jnp.float32),
        grid_spec=pltpu.PrefetchScalarGridSpec(
            num_scalar_prefetch=0,
            grid=(1,),                                   # single step: no per-b overhead
            in_specs=[
                pl.BlockSpec((KK1, R), lambda i: (0, 0)),
                pl.BlockSpec((COUT, KK1), lambda i: (0, 0)),
                pl.BlockSpec((COUT, R), lambda i: (0, 0)),
                pl.BlockSpec((COUT, R), lambda i: (0, 0)),
                pl.BlockSpec((R, B), lambda i: (0, 0)),
            ],
            out_specs=pl.BlockSpec((1, B), lambda i: (0, 0)),
        ),
        compiler_params=pltpu.CompilerParams(
            dimension_semantics=("arbitrary",)),
    )(patches_t, w_aug, fcw_t, pidx_t, sel)

    return out_1b.reshape(B, 1)                                        # (B, 1), row b = batch b


def forward_ref_np(x, conv_w, conv_b, fc_w, param_idx):
    """float64 NumPy reference mirroring the PyTorch forward exactly."""
    x = np.asarray(x, np.float64)
    w = np.asarray(conv_w, np.float64)
    b = np.asarray(conv_b, np.float64)
    fcw = np.asarray(fc_w, np.float64)
    pidx = np.asarray(param_idx, np.float64)

    conv = np.zeros((B, COUT, HOUT, WOUT), np.float64)
    for kh in range(KH):
        for kw in range(KW):
            patch = x[:, :, kh:kh + HOUT, kw:kw + WOUT]                # (B, CIN, HOUT, WOUT)
            conv += np.einsum('bihw,oi->bohw', patch, w[:, :, kh, kw])
    conv += b[None, :, None, None]
    flat = conv.reshape(B, -1)                                         # NCHW flatten order
    mask = (fcw.reshape(-1) * pidx).reshape(-1, 1)
    return flat @ mask                                                 # (B, 1)


if __name__ == "__main__":
    key = jax.random.PRNGKey(0)
    kx, kw, kb, kfc, kp = jax.random.split(key, 5)

    # Deterministic synthetic parameters (shapes implied by the module's __init__).
    x = jax.random.normal(kx, (B, CIN, H, W), jnp.float32)
    conv_w = jax.random.normal(kw, (COUT, CIN, KH, KW), jnp.float32) * 0.1
    conv_b = jax.random.normal(kb, (COUT,), jnp.float32) * 0.1
    fc_w = jax.random.normal(kfc, (1, F), jnp.float32) * 0.05
    param_idx = (jax.random.uniform(kp, (F,)) > 0.5).astype(jnp.float32)

    out = jax.block_until_ready(trim_ft_forward(x, conv_w, conv_b, fc_w, param_idx))
    ref = forward_ref_np(np.asarray(x), np.asarray(conv_w), np.asarray(conv_b),
                         np.asarray(fc_w), np.asarray(param_idx))

    assert out.shape == (B, 1)
    # Tolerance covers the MXU f32 matmul pass precision vs. the float64 reference.
    np.testing.assert_allclose(np.asarray(out), ref, rtol=1e-2, atol=1e-2)
    print("KERNEL_OK")
</pallas_src>

<mosaic_0001>
module attributes {stable_mosaic.version = 11 : i64} {
  func.func @trim_ft_kernel(%arg0: i32, %arg1: memref<37x392xf32, #tpu.memory_space<vmem>>, %arg2: memref<8x37xf32, #tpu.memory_space<vmem>>, %arg3: memref<8x392xf32, #tpu.memory_space<vmem>>, %arg4: memref<8x392xf32, #tpu.memory_space<vmem>>, %arg5: memref<392x2xf32, #tpu.memory_space<vmem>>, %arg6: memref<1x2xf32, #tpu.memory_space<vmem>>) attributes {dimension_semantics = [#tpu.dimension_semantics<arbitrary>], iteration_bounds = array<i64: 1>, scalar_prefetch = 0 : i64, scratch_operands = 0 : i64, tpu.core_type = #tpu.core_type<tc>, window_params = [{pipeline_mode = #tpu.pipeline_mode<synchronous>, transform_indices = @transform_0, window_bounds = array<i64: 37, 392>}, {pipeline_mode = #tpu.pipeline_mode<synchronous>, transform_indices = @transform_1, window_bounds = array<i64: 8, 37>}, {pipeline_mode = #tpu.pipeline_mode<synchronous>, transform_indices = @transform_2, window_bounds = array<i64: 8, 392>}, {pipeline_mode = #tpu.pipeline_mode<synchronous>, transform_indices = @transform_3, window_bounds = array<i64: 8, 392>}, {pipeline_mode = #tpu.pipeline_mode<synchronous>, transform_indices = @transform_4, window_bounds = array<i64: 392, 2>}, {pipeline_mode = #tpu.pipeline_mode<synchronous>, transform_indices = @transform_5, window_bounds = array<i64: 1, 2>}]} {
    %c0 = arith.constant 0 : index
    %c0_0 = arith.constant 0 : index
    %0 = vector.load %arg2[%c0, %c0_0] : memref<8x37xf32, #tpu.memory_space<vmem>>, vector<8x37xf32>
    %c0_1 = arith.constant 0 : index
    %c0_2 = arith.constant 0 : index
    %1 = vector.load %arg1[%c0_1, %c0_2] : memref<37x392xf32, #tpu.memory_space<vmem>>, vector<37x392xf32>
    %cst = arith.constant dense<0.000000e+00> : vector<8x392xf32>
    %2 = tpu.matmul %0, %1, %cst {dimension_numbers = #tpu.dot_dimension_numbers<[1], [0], [0], [1], [0, 0, 1, 1], [], []>} : vector<8x37xf32>, vector<37x392xf32>, vector<8x392xf32> -> vector<8x392xf32>
    %c0_3 = arith.constant 0 : index
    %c0_4 = arith.constant 0 : index
    %3 = vector.load %arg3[%c0_3, %c0_4] : memref<8x392xf32, #tpu.memory_space<vmem>>, vector<8x392xf32>
    %c0_5 = arith.constant 0 : index
    %c0_6 = arith.constant 0 : index
    %4 = vector.load %arg4[%c0_5, %c0_6] : memref<8x392xf32, #tpu.memory_space<vmem>>, vector<8x392xf32>
    %5 = arith.mulf %3, %4 : vector<8x392xf32>
    %6 = arith.mulf %2, %5 : vector<8x392xf32>
    %c0_7 = arith.constant 0 : index
    %c0_8 = arith.constant 0 : index
    %7 = vector.load %arg5[%c0_7, %c0_8] : memref<392x2xf32, #tpu.memory_space<vmem>>, vector<392x2xf32>
    %cst_9 = arith.constant dense<0.000000e+00> : vector<8x2xf32>
    %8 = tpu.matmul %6, %7, %cst_9 {dimension_numbers = #tpu.dot_dimension_numbers<[1], [0], [0], [1], [0, 0, 1, 1], [], []>} : vector<8x392xf32>, vector<392x2xf32>, vector<8x2xf32> -> vector<8x2xf32>
    %cst_10 = arith.constant dense<0.000000e+00> : vector<2xf32>
    %9 = vector.multi_reduction <add>, %8, %cst_10 [0] : vector<8x2xf32> to vector<2xf32>
    %10 = vector.shape_cast %9 : vector<2xf32> to vector<1x2xf32>
    %c0_11 = arith.constant 0 : index
    %c0_12 = arith.constant 0 : index
    %11 = vector.load %arg6[%c0_11, %c0_12] : memref<1x2xf32, #tpu.memory_space<vmem>>, vector<1x2xf32>
    tpu.vector_store %arg6[%c0_11, %c0_12], %10 {strides = array<i32>} : memref<1x2xf32, #tpu.memory_space<vmem>>, vector<1x2xf32>,
    return
  }
  func.func @transform_0(%arg0: i32) -> (i32, i32) {
    %c0_i32 = arith.constant 0 : i32
    %c0_i32_0 = arith.constant 0 : i32
    %c0_i32_1 = arith.constant 0 : i32
    return %c0_i32, %c0_i32_0 : i32, i32
  }
  func.func @transform_1(%arg0: i32) -> (i32, i32) {
    %c0_i32 = arith.constant 0 : i32
    %c0_i32_0 = arith.constant 0 : i32
    %c0_i32_1 = arith.constant 0 : i32
    return %c0_i32, %c0_i32_0 : i32, i32
  }
  func.func @transform_2(%arg0: i32) -> (i32, i32) {
    %c0_i32 = arith.constant 0 : i32
    %c0_i32_0 = arith.constant 0 : i32
    %c0_i32_1 = arith.constant 0 : i32
    return %c0_i32, %c0_i32_0 : i32, i32
  }
  func.func @transform_3(%arg0: i32) -> (i32, i32) {
    %c0_i32 = arith.constant 0 : i32
    %c0_i32_0 = arith.constant 0 : i32
    %c0_i32_1 = arith.constant 0 : i32
    return %c0_i32, %c0_i32_0 : i32, i32
  }
  func.func @transform_4(%arg0: i32) -> (i32, i32) {
    %c0_i32 = arith.constant 0 : i32
    %c0_i32_0 = arith.constant 0 : i32
    %c0_i32_1 = arith.constant 0 : i32
    return %c0_i32, %c0_i32_0 : i32, i32
  }
  func.func @transform_5(%arg0: i32) -> (i32, i32) {
    %c0_i32 = arith.constant 0 : i32
    %c0_i32_0 = arith.constant 0 : i32
    %c0_i32_1 = arith.constant 0 : i32
    return %c0_i32, %c0_i32_0 : i32, i32
  }
}

</mosaic_0001>

<bundles_post_ra>
// kernel: tpu_custom_call.1
= control target key start
LH: loop header
LB: loop body
LE: loop exit
PB: predicated region body
PF: predicated region fallthrough
CT: control target
= control target key end

     0   :  { %vm46_vm0 = vcmask 1044480   ;;  %vm42_vm1 = vcmask 302080   ;;  %v500_v21 = vmov 0.0   ;;  %s788_s0 = inlined_call_operand.vmem [shape: f32[37,392], index: 0, kind: input, shape index: {}]   ;;  %s789_s1 = inlined_call_operand.vmem [shape: f32[8,37], index: 1, kind: input, shape index: {}]   ;;  %s790_s2 = inlined_call_operand.vmem [shape: f32[8,392], index: 2, kind: input, shape index: {}]   ;;  %s791_s3 = inlined_call_operand.vmem [shape: f32[8,392], index: 3, kind: input, shape index: {}]   ;;  %s792_s4 = inlined_call_operand.vmem [shape: f32[392,2], index: 4, kind: input, shape index: {}]   ;;  %s793_s5 = inlined_call_operand.hbm [shape: f32[1,2], index: 5, kind: output, shape index: {}]  }
   0x1   :  { %v39_v0 = vld [vmem:[%s788_s0 + $0x88] sm:$0x1f]  ;;  %v41_v1 = vld [vmem:[%s788_s0 + $0x98] sm:$0x1f]  ;;  %v38_v3 = vld [vmem:[%s788_s0 + $0x80] sm:$0x1f]  ;;  %123 = vmatprep.mubr.f32.mxu0 %v500_v21  ;;  %194 = vmatprep.mubr.f32.mxu1 %v500_v21 }
   0x2   :  { %v35_v2 = vld [vmem:[%s788_s0 + $0x68] sm:$0xff]  ;;  %434 = vmatprep.subr.msk.mxu0 %vm46_vm0, %v39_v0  ;;  %437 = vmatprep.subr.msk.mxu1 %vm46_vm0, %v41_v1  ;;  %v40_v4 = vld [vmem:[%s788_s0 + $0x90] sm:$0x1f]  ;;  %v37_v5 = vld [vmem:[%s788_s0 + $0x78] sm:$0xff] }
   0x3   :  { %435 = vmatpush1.msk.msra.mxu0 %vm46_vm0, %v38_v3  ;;  %438 = vmatpush1.msk.msra.mxu1 %vm46_vm0, %v40_v4  ;;  %v34_v6 = vld [vmem:[%s788_s0 + $0x60] sm:$0xff]  ;;  %v36_v7 = vld [vmem:[%s788_s0 + $0x70] sm:$0xff]  ;;  %v31_v8 = vld [vmem:[%s788_s0 + $0x48] sm:$0xff] }
   0x4   :  { %83 = vmatprep.subr.mxu0 %v35_v2  ;;  %154 = vmatprep.subr.mxu1 %v37_v5  ;;  %v33_v9 = vld [vmem:[%s788_s0 + $0x58] sm:$0xff]  ;;  %v30_v10 = vld [vmem:[%s788_s0 + $0x40] sm:$0xff]  ;;  %v32_v11 = vld [vmem:[%s788_s0 + $0x50] sm:$0xff] }
   0x5   :  { %84 = vmatpush1.msra.mxu0 %v34_v6  ;;  %155 = vmatpush1.msra.mxu1 %v36_v7  ;;  %v27_v12 = vld [vmem:[%s788_s0 + $0x28] sm:$0xff]  ;;  %v29_v13 = vld [vmem:[%s788_s0 + $0x38] sm:$0xff]  ;;  %v26_v14 = vld [vmem:[%s788_s0 + $0x20] sm:$0xff] }
   0x6   :  { %85 = vmatprep.subr.mxu0 %v31_v8  ;;  %156 = vmatprep.subr.mxu1 %v33_v9  ;;  %v28_v15 = vld [vmem:[%s788_s0 + $0x30] sm:$0xff]  ;;  %v23_v16 = vld [vmem:[%s788_s0 + $0x8] sm:$0xff]  ;;  %v25_v17 = vld [vmem:[%s788_s0 + $0x18] sm:$0xff] }
   0x7   :  { %86 = vmatpush1.msra.mxu0 %v30_v10  ;;  %157 = vmatpush1.msra.mxu1 %v32_v11  ;;  %v22_v18 = vld [vmem:[%s788_s0] sm:$0xff]  ;;  %v24_v19 = vld [vmem:[%s788_s0 + $0x10] sm:$0xff]  ;;  %v248_v22 = vld [vmem:[%s792_s4 + $0xf8] sm:$0xff] }
   0x8   :  { %87 = vmatprep.subr.mxu0 %v27_v12  ;;  %158 = vmatprep.subr.mxu1 %v29_v13  ;;  %v21_v20 = vld [vmem:[%s789_s1] sm:$0xff]  ;;  %v264_v23 = vld [vmem:[%s792_s4 + $0x178] sm:$0xff]  ;;  %v247_v25 = vld [vmem:[%s792_s4 + $0xf0] sm:$0xff] }
   0x9   :  { %88 = vmatpush1.msra.mxu0 %v26_v14  ;;  %159 = vmatpush1.msra.mxu1 %v28_v15  ;;  %v232_v24 = vld [vmem:[%s792_s4 + $0x78] sm:$0xff]  ;;  %v263_v26 = vld [vmem:[%s792_s4 + $0x170] sm:$0xff]  ;;  %v246_v28 = vld [vmem:[%s792_s4 + $0xe8] sm:$0xff] }
   0xa   :  { %89 = vmatprep.subr.mxu0 %v23_v16  ;;  %160 = vmatprep.subr.mxu1 %v25_v17  ;;  %v231_v27 = vld [vmem:[%s792_s4 + $0x70] sm:$0xff]  ;;  %v262_v29 = vld [vmem:[%s792_s4 + $0x168] sm:$0xff]  ;;  %v245_v31 = vld [vmem:[%s792_s4 + $0xe0] sm:$0xff] }
   0xb   :  { %90 = vmatpush1.msra.mxu0 %v22_v18  ;;  %161 = vmatpush1.msra.mxu1 %v24_v19  ;;  %v230_v30 = vld [vmem:[%s792_s4 + $0x68] sm:$0xff]  ;;  %v261_v32 = vld [vmem:[%s792_s4 + $0x160] sm:$0xff]  ;;  %v244_v34 = vld [vmem:[%s792_s4 + $0xd8] sm:$0xff] }
   0xc   :  { %436 = vmatmul.mubr.msk.f32.vlgmr.msra.gmra.mxu0 %vm42_vm1, %v21_v20  ;;  %439 = vmatmul.mubr.msk.f32.vlgmr.msra.gmra.mxu1 %vm42_vm1, %v21_v20  ;;  %v229_v33 = vld [vmem:[%s792_s4 + $0x60] sm:$0xff]  ;;  %v260_v35 = vld [vmem:[%s792_s4 + $0x158] sm:$0xff]  ;;  %v243_v37 = vld [vmem:[%s792_s4 + $0xd0] sm:$0xff] }
   0xd   :  { %340 = vmatprep.subr.mxu1 %v500_v21  ;;  %441 = vmatprep.subr.mxu0 %v248_v22  ;;  %v228_v36 = vld [vmem:[%s792_s4 + $0x58] sm:$0xff] }
   0xe   :  { %341 = vmatpush1.msra.mxu1 %v264_v23  ;;  %442 = vmatpush3.msra.mxu0 %v232_v24 }
   0xf   :  { %342 = vmatprep.subr.mxu1 %v500_v21  ;;  %443 = vmatprep.subr.mxu0 %v247_v25 }
  0x10   :  { %343 = vmatpush1.msra.mxu1 %v263_v26  ;;  %444 = vmatpush3.msra.mxu0 %v231_v27 }
  0x11   :  { %344 = vmatprep.subr.mxu1 %v500_v21  ;;  %445 = vmatprep.subr.mxu0 %v246_v28 }
  0x12   :  { %345 = vmatpush1.msra.mxu1 %v262_v29  ;;  %446 = vmatpush3.msra.mxu0 %v230_v30 }
  0x13   :  { %346 = vmatprep.subr.mxu1 %v500_v21  ;;  %447 = vmatprep.subr.mxu0 %v245_v31 }
  0x14   :  { %347 = vmatpush1.msra.mxu1 %v261_v32  ;;  %448 = vmatpush3.msra.mxu0 %v229_v33 }
  0x15   :  { %10 = vsyncpa [#allocation3], 0  ;;  %348 = vmatprep.subr.mxu1 %v500_v21  ;;  %449 = vmatprep.subr.mxu0 %v244_v34  ;;  %v259_v38 = vld [vmem:[%s792_s4 + $0x150] sm:$0xff]  ;;  %v242_v40 = vld [vmem:[%s792_s4 + $0xc8] sm:$0xff]  ;;  %vm266_vm2 = vcmask 64512   ;;  %vm410_vm3 = vcmask 15360  }
  0x16   :  { %v227_v39 = vld [vmem:[%s792_s4 + $0x50] sm:$0xff]  ;;  %349 = vmatpush1.msra.mxu1 %v260_v35  ;;  %450 = vmatpush3.msra.mxu0 %v228_v36  ;;  %v258_v41 = vld [vmem:[%s792_s4 + $0x148] sm:$0xff]  ;;  %v241_v43 = vld [vmem:[%s792_s4 + $0xc0] sm:$0xff]  ;;  %vm418_vm4 = vcmask 8192  }
  0x17   :  { %350 = vmatprep.subr.mxu1 %v500_v21  ;;  %451 = vmatprep.subr.mxu0 %v243_v37  ;;  %v226_v42 = vld [vmem:[%s792_s4 + $0x48] sm:$0xff]  ;;  %v257_v44 = vld [vmem:[%s792_s4 + $0x140] sm:$0xff]  ;;  %v240_v46 = vld [vmem:[%s792_s4 + $0xb8] sm:$0xff] }
  0x18   :  { %351 = vmatpush1.msra.mxu1 %v259_v38  ;;  %452 = vmatpush3.msra.mxu0 %v227_v39  ;;  %v225_v45 = vld [vmem:[%s792_s4 + $0x40] sm:$0xff]  ;;  %v256_v47 = vld [vmem:[%s792_s4 + $0x138] sm:$0xff]  ;;  %v239_v49 = vld [vmem:[%s792_s4 + $0xb0] sm:$0xff] }
  0x19   :  { %352 = vmatprep.subr.mxu1 %v500_v21  ;;  %453 = vmatprep.subr.mxu0 %v242_v40  ;;  %v224_v48 = vld [vmem:[%s792_s4 + $0x38] sm:$0xff]  ;;  %v255_v50 = vld [vmem:[%s792_s4 + $0x130] sm:$0xff]  ;;  %v238_v52 = vld [vmem:[%s792_s4 + $0xa8] sm:$0xff] }
  0x1a   :  { %353 = vmatpush1.msra.mxu1 %v258_v41  ;;  %454 = vmatpush3.msra.mxu0 %v226_v42  ;;  %v223_v51 = vld [vmem:[%s792_s4 + $0x30] sm:$0xff]  ;;  %v254_v53 = vld [vmem:[%s792_s4 + $0x128] sm:$0xff]  ;;  %v237_v55 = vld [vmem:[%s792_s4 + $0xa0] sm:$0xff] }
  0x1b   :  { %354 = vmatprep.subr.mxu1 %v500_v21  ;;  %455 = vmatprep.subr.mxu0 %v241_v43  ;;  %v222_v54 = vld [vmem:[%s792_s4 + $0x28] sm:$0xff]  ;;  %v253_v56 = vld [vmem:[%s792_s4 + $0x120] sm:$0xff]  ;;  %v236_v58 = vld [vmem:[%s792_s4 + $0x98] sm:$0xff] }
  0x1c   :  { %355 = vmatpush1.msra.mxu1 %v257_v44  ;;  %456 = vmatpush3.msra.mxu0 %v225_v45  ;;  %v221_v57 = vld [vmem:[%s792_s4 + $0x20] sm:$0xff]  ;;  %v252_v59 = vld [vmem:[%s792_s4 + $0x118] sm:$0xff]  ;;  %v251_v61 = vld [vmem:[%s792_s4 + $0x110] sm:$0xff] }
  0x1d   :  { %356 = vmatprep.subr.mxu1 %v500_v21  ;;  %457 = vmatprep.subr.mxu0 %v240_v46  ;;  %v220_v60 = vld [vmem:[%s792_s4 + $0x18] sm:$0xff]  ;;  %v235_v62 = vld [vmem:[%s792_s4 + $0x90] sm:$0xff]  ;;  %v250_v0 = vld [vmem:[%s792_s4 + $0x108] sm:$0xff] }
  0x1e   :  { %357 = vmatpush1.msra.mxu1 %v256_v47  ;;  %458 = vmatpush3.msra.mxu0 %v224_v48  ;;  %v219_v63 = vld [vmem:[%s792_s4 + $0x10] sm:$0xff]  ;;  %v234_v1 = vld [vmem:[%s792_s4 + $0x88] sm:$0xff]  ;;  %v249_v3 = vld [vmem:[%s792_s4 + $0x100] sm:$0xff] }
  0x1f   :  { %358 = vmatprep.subr.mxu1 %v500_v21  ;;  %459 = vmatprep.subr.mxu0 %v239_v49  ;;  %v218_v2 = vld [vmem:[%s792_s4 + $0x8] sm:$0xff]  ;;  %v233_v4 = vld [vmem:[%s792_s4 + $0x80] sm:$0xff]  ;;  %v203_v7 = vld [vmem:[%s790_s2 + $0x10] sm:$0xff] }
  0x20   :  { %359 = vmatpush1.msra.mxu1 %v255_v50  ;;  %460 = vmatpush3.msra.mxu0 %v223_v51  ;;  %v217_v5 = vld [vmem:[%s792_s4] sm:$0xff]  ;;  %v207_v8 = vld [vmem:[%s791_s3 + $0x10] sm:$0xff]  ;;  %v202_v9 = vld [vmem:[%s790_s2 + $0x8] sm:$0xff] }
  0x21   :  { %360 = vmatprep.subr.mxu1 %v500_v21  ;;  %461 = vmatprep.subr.mxu0 %v238_v52  ;;  %v265_v6 = vld [vmem:[%s792_s4 + $0x180] sm:$0xff]  ;;  %v206_v10 = vld [vmem:[%s791_s3 + $0x8] sm:$0xff]  ;;  %v204_v11 = vld [vmem:[%s790_s2 + $0x18] sm:$0xff]  ;;  %v211_v15 = vmul.f32 %v207_v8, %v203_v7 }
  0x22   :  { %361 = vmatpush1.msra.mxu1 %v254_v53  ;;  %462 = vmatpush3.msra.mxu0 %v222_v54  ;;  %v208_v12 = vld [vmem:[%s791_s3 + $0x18] sm:$0xff]  ;;  %v201_v13 = vld [vmem:[%s790_s2] sm:$0xff]  ;;  %v210_v16 = vmul.f32 %v206_v10, %v202_v9  ;;  %s501_s2 = smov [#allocation2]  }
  0x23   :  { %362 = vmatprep.subr.mxu1 %v500_v21  ;;  %463 = vmatprep.subr.mxu0 %v237_v55  ;;  %v205_v14 = vld [vmem:[%s791_s3] sm:$0xff]  ;;  %v212_v17 = vmul.f32 %v208_v12, %v204_v11  ;;  %s426_s3 = sshll.u32 %s501_s2, 4  ;;  %s427_s3 = int_to_ptr.vmem [resolvable:$true] %s426_s3 }
  0x24   :  { %363 = vmatpush1.msra.mxu1 %v253_v56  ;;  %464 = vmatpush3.msra.mxu0 %v221_v57  ;;  %v209_v19 = vmul.f32 %v205_v14, %v201_v13  ;;  %s478_s14 = scalar_lea.vmem %s427_s3, 16  ;;  %s482_s1 = scalar_lea.vmem %s427_s3, 32 }
  0x25   :  { %364 = vmatprep.subr.mxu1 %v500_v21  ;;  %465 = vmatprep.subr.mxu0 %v236_v58  ;;  %p479_p0 = scmp.ne.s32.totalorder %s427_s3, %s478_s14  ;;  %p483_p1 = scmp.lt.s32.totalorder %s427_s3, %s427_s3 }
  0x26   :  { %365 = vmatpush1.msra.mxu1 %v252_v59  ;;  %466 = vmatpush3.msra.mxu0 %v220_v60  ;;  %p484_p2 = scmp.lt.s32.totalorder %s482_s1, %s478_s14 }
  0x27   :  { %366 = vmatprep.subr.mxu1 %v500_v21  ;;  %467 = vmatprep.subr.mxu0 %v235_v62 }
  0x28   :  { %367 = vmatpush1.msra.mxu1 %v251_v61  ;;  %468 = vmatpush3.msra.mxu0 %v219_v63  ;;  %p485_p3 = por %p484_p2, %p483_p1 }
  0x29   :  { %368 = vmatprep.subr.mxu1 %v500_v21  ;;  %469 = vmatprep.subr.mxu0 %v234_v1 }
  0x2a   :  { %369 = vmatpush1.msra.mxu1 %v250_v0  ;;  %470 = vmatpush3.msra.mxu0 %v218_v2  ;;  %p486_p4 = pnand %p485_p3, %p479_p0 }
  0x2b   :  { %370 = vmatprep.subr.mxu1 %v500_v21  ;;  %471 = vmatprep.subr.mxu0 %v233_v4 }
  0x2c   :  { %371 = vmatpush1.msra.mxu1 %v249_v3  ;;  %472 = vmatpush3.msra.mxu0 %v217_v5 }
  0x2d   :  { %402 = vmatprep.subr.mxu1 %v500_v21 }
  0x2e   :  { %403 = vmatpush2.msra.mxu1 %v265_v6 }
  0xcc   :  { %v125_v18 = vpop.f32.mrf.mxu0  ;;  %v196_v20 = vpop.f32.mrf.mxu1 }
  0xcd   :  { %v215_v21 = vmul.f32 %v211_v15, %v196_v20  ;;  %v213_v26 = vmul.f32 %v209_v19, %v125_v18 }
  0xce   :  { %v127_v22 = vpop.f32.mrf.mxu0  ;;  %v198_v23 = vpop.f32.mrf.mxu1 }
  0xcf   :  { %v214_v24 = vmul.f32 %v210_v16, %v127_v22  ;;  %v216_v25 = vmul.f32 %v212_v17, %v198_v23 }
  0xd1   :  { %334 = vmatprep.mubr.f32.mxu0 %v214_v24  ;;  %440 = vmatprep.mubr.msk.f32.mxu1 %vm266_vm2, %v216_v25 }
  0xd2   :  { %335 = vmatmul.mubr.f32.vlgmr.msra.gmra.mxu0 %v213_v26  ;;  %405 = vmatmul.mubr.f32.vlgmr.msra.gmra.mxu1 %v215_v21 }
 0x192   :  { %v473_v27 = vpop.f32.mrf.mxu0  ;;  %v406_v28 = vpop.f32.mrf.mxu1 }
 0x194   :  { %v474_v29 = vpop.f32.mrf.mxu0  ;;  %v408_v30 = vpop.f32.mrf.mxu1 }
 0x195   :  { %v475_v31 = vadd.f32 %v474_v29, %v473_v27 }
 0x197   :  { %v407_v32 = vadd.f32 %v475_v31, %v406_v28 }
 0x199   :  { %v411_v33 = vsel %vm410_vm3, %v407_v32, 0.0 }
 0x19a   :  { %v412_v34 = vrot.slane %v411_v33, 4 }
 0x19c   :  { %v413_v35 = vadd.f32 %v412_v34, %v411_v33 }
 0x19e   :  { %v414_v36 = vrot.slane %v413_v35, 2 }
 0x1a0   :  { %v415_v37 = vadd.f32 %v414_v36, %v413_v35 }
 0x1a2   :  { %v416_v38 = vrot.slane %v415_v37, 1 }
 0x1a4   :  { %v417_v39 = vadd.f32 %v416_v38, %v415_v37 }
 0x1a6   :  { %419 = vst.msk [vmem:[#allocation2] sm:$0x1] %vm418_vm4, %v417_v39 }
 0x1a7   :  { %489 = shalt.err (!%p486_p4)
}
 0x1a8   :  { %429 = dma.vmem_to_hbm [thread:$0]  %s427_s3, 16, %s793_s5, [#allocation3]  }
 0x1a9   :  { %498 = dma.done.wait [#allocation3], 16  }
 0x1aa   :  { %499 = vsyncadd [#allocation3], 4294967280 }
 0x1ab   :  { %433 = vsyncpa [#allocation3], 1 }

</bundles_post_ra>
